<compile_context>
chip_gen: v5e
topology: v5e:2x2
jax: 0.10.0
libtpu: 0.0.40
codegen_flags: <defaults>
</compile_context>

<pallas_src>
import functools

import jax
import jax.numpy as jnp
from jax import lax
from jax.experimental import pallas as pl
from jax.experimental.pallas import tpu as pltpu


# ----------------------------- Pallas kernel -------------------------------
def autoencoder_kernel(
    x_ref,        # (T*B, N)   piano roll, (t,b)-major rows
    w_ih_e_ref,   # (N, H_e)   encoder RNN input weights (pre-transposed)
    w_hh_e_ref,   # (H_e, H_e) encoder RNN hidden weights (pre-transposed)
    b_e_ref,      # (1, H_e)   encoder RNN bias (b_ih + b_hh)
    w_comb_ref,   # (H_e, H_d) fused enc-FC @ dec-input-proj weights
    b_comb_ref,   # (1, H_d)   fused bias (enc_fc_b @ dec_w_ih.T + dec biases)
    w_hh_d_ref,   # (H_d, H_d) decoder RNN hidden weights (pre-transposed)
    w_fcd_ref,    # (H_d, N)   decoder FC weights (pre-transposed)
    b_fcd_ref,    # (1, N)
    out_ref,      # (T*B, N)   decoder logits, (t,b)-major rows
    ys_ref,       # scratch VMEM (T*B, H_d): decoder hidden states, (t,b)-major
    *, B, T,
):
    whe = w_hh_e_ref[...]
    whd = w_hh_d_ref[...]

    # ---- Encoder input projection: ONE matmul over all timesteps (bias folded)
    xproj = (jnp.dot(x_ref[...], w_ih_e_ref[...],
                     preferred_element_type=jnp.float32)
             + b_e_ref[...])                                  # (T*B, H_e)

    # ---- Encoder tanh recurrence (statically unrolled); t=0 skips zero-h matmul
    h = jnp.tanh(xproj[0:B])
    for t in range(1, T):
        h = jnp.tanh(xproj[t * B:(t + 1) * B]
                     + jnp.dot(h, whe, preferred_element_type=jnp.float32))

    # ---- Fused encoder FC + decoder input projection (latent never built) ----
    inp_d = (jnp.dot(h, w_comb_ref[...], preferred_element_type=jnp.float32)
             + b_comb_ref[...])                               # (B, H_d)

    # ---- Decoder recurrence; t=0 skips zero-hd matmul; contiguous slab stores
    hd = jnp.tanh(inp_d)
    ys_ref[0:B, :] = hd
    for t in range(1, T):
        hd = jnp.tanh(inp_d
                      + jnp.dot(hd, whd, preferred_element_type=jnp.float32))
        ys_ref[t * B:(t + 1) * B, :] = hd

    # ---- Decoder FC over all (T*B) hidden states in one matmul, no reshape ----
    out_ref[...] = (jnp.dot(ys_ref[...], w_fcd_ref[...],
                            preferred_element_type=jnp.float32)
                    + b_fcd_ref[...])


# --------------------- one-time param re-layout (hoisted) -------------------
def prepare_params(params):
    """Torch-layout params -> kernel-layout params. Call once, outside jit."""
    w_comb = params["enc_fc_w"].T @ params["dec_w_ih"].T      # (H_e, H_d)
    b_comb = (params["enc_fc_b"] @ params["dec_w_ih"].T
              + params["dec_b_ih"] + params["dec_b_hh"])       # (H_d,)
    return {
        "w_ih_e": params["enc_w_ih"].T,                        # (N, H_e)
        "w_hh_e": params["enc_w_hh"].T,                        # (H_e, H_e)
        "b_e": (params["enc_b_ih"] + params["enc_b_hh"])[None, :],
        "w_comb": w_comb,
        "b_comb": b_comb[None, :],
        "w_hh_d": params["dec_w_hh"].T,                        # (H_d, H_d)
        "w_fcd": params["dec_fc_w"].T,                         # (H_d, N)
        "b_fcd": params["dec_fc_b"][None, :],
    }


# ------------------------------ JAX wrapper ---------------------------------
@jax.jit
def autoencoder_forward(x, kparams):
    """x: (B, T, N); kparams: prepare_params() output. Returns (B*T, N)."""
    B, T, N = x.shape
    H_e = kparams["w_hh_e"].shape[0]
    H_d = kparams["w_hh_d"].shape[0]

    # Pre-flatten to (t,b)-major rows in XLA (fuses into the transpose we pay anyway).
    x_flat = jnp.transpose(x, (1, 0, 2)).reshape(T * B, N)

    args = (
        x_flat,
        kparams["w_ih_e"], kparams["w_hh_e"], kparams["b_e"],
        kparams["w_comb"], kparams["b_comb"],
        kparams["w_hh_d"], kparams["w_fcd"], kparams["b_fcd"],
    )

    flops = (2 * T * B * N * H_e          # encoder input projection
             + 2 * (T - 1) * B * H_e * H_e  # encoder recurrence
             + 2 * B * H_e * H_d            # fused enc-FC + dec input proj
             + 2 * (T - 1) * B * H_d * H_d  # decoder recurrence
             + 2 * T * B * H_d * N)         # decoder FC
    bytes_accessed = 4 * (T * B * N                       # x
                          + N * H_e + H_e * H_e + H_e     # encoder RNN
                          + H_e * H_d + H_d               # fused projection
                          + H_d * H_d                     # decoder RNN
                          + H_d * N + N                   # decoder FC
                          + T * B * N)                    # output

    out_tb = pl.pallas_call(
        functools.partial(autoencoder_kernel, B=B, T=T),
        out_shape=jax.ShapeDtypeStruct((T * B, N), jnp.float32),
        in_specs=[pl.BlockSpec(memory_space=pltpu.MemorySpace.VMEM)] * len(args),
        out_specs=pl.BlockSpec(memory_space=pltpu.MemorySpace.VMEM),
        scratch_shapes=[pltpu.VMEM((T * B, H_d), jnp.float32)],
        cost_estimate=pl.CostEstimate(
            flops=flops,
            transcendentals=T * B * (H_e + H_d),
            bytes_accessed=bytes_accessed),
    )(*args)

    # Kernel emits (t,b)-major rows; PyTorch's fc(ys).reshape(-1, N) is
    # (b,t)-major -> tiny XLA transpose outside the kernel.
    return jnp.transpose(out_tb.reshape(T, B, N), (1, 0, 2)).reshape(B * T, N)


# --------------------------- pure-JAX reference ------------------------------
def reference_forward(x, params):
    def rnn(xs_bt, w_ih, w_hh, b_ih, b_hh):
        B = xs_bt.shape[0]
        H = w_hh.shape[0]

        def step(h, x_t):
            h = jnp.tanh(x_t @ w_ih.T + b_ih + h @ w_hh.T + b_hh)
            return h, h

        h0 = jnp.zeros((B, H), jnp.float32)
        _, hs = lax.scan(step, h0, jnp.swapaxes(xs_bt, 0, 1))
        return jnp.swapaxes(hs, 0, 1)  # (B, T, H)

    B, T, N = x.shape
    enc_ys = rnn(x, params["enc_w_ih"], params["enc_w_hh"],
                 params["enc_b_ih"], params["enc_b_hh"])
    latent = enc_ys[:, -1, :] @ params["enc_fc_w"].T + params["enc_fc_b"]
    dec_in = jnp.repeat(latent[:, None, :], T, axis=1)
    dec_ys = rnn(dec_in, params["dec_w_ih"], params["dec_w_hh"],
                 params["dec_b_ih"], params["dec_b_hh"])
    logits = dec_ys @ params["dec_fc_w"].T + params["dec_fc_b"]
    return logits.reshape(-1, N)


# ------------------------------- main ----------------------------------------
def make_params(key, n_note, h_enc, z, h_dec):
    def uni(k, shape, fan):
        bound = 1.0 / jnp.sqrt(fan)
        return jax.random.uniform(k, shape, jnp.float32, -bound, bound)

    ks = jax.random.split(key, 12)
    return {
        "enc_w_ih": uni(ks[0], (h_enc, n_note), h_enc),
        "enc_w_hh": uni(ks[1], (h_enc, h_enc), h_enc),
        "enc_b_ih": uni(ks[2], (h_enc,), h_enc),
        "enc_b_hh": uni(ks[3], (h_enc,), h_enc),
        "enc_fc_w": uni(ks[4], (z, h_enc), h_enc),
        "enc_fc_b": uni(ks[5], (z,), h_enc),
        "dec_w_ih": uni(ks[6], (h_dec, z), h_dec),
        "dec_w_hh": uni(ks[7], (h_dec, h_dec), h_dec),
        "dec_b_ih": uni(ks[8], (h_dec,), h_dec),
        "dec_b_hh": uni(ks[9], (h_dec,), h_dec),
        "dec_fc_w": uni(ks[10], (n_note, h_dec), h_dec),
        "dec_fc_b": uni(ks[11], (n_note,), h_dec),
    }


if __name__ == "__main__":
    # Small hyperparameters consistent with the module:
    #   n_note_class = data_note_high - data_note_low + 1 = 16
    #   sequence_length = data_resolution_nth_note * data_length_bars = 8
    #   cmp_enc_rnn_hidden_size = 32, cmp_hidden_size = 8, cmp_dec_rnn_hidden_size = 32
    B, T, N = 2, 8, 16
    H_ENC, Z, H_DEC = 32, 8, 32

    key = jax.random.PRNGKey(0)
    k_x, k_p = jax.random.split(key)
    # Binary-ish piano roll input, float32.
    x = (jax.random.uniform(k_x, (B, T, N)) > 0.7).astype(jnp.float32)
    params = make_params(k_p, N, H_ENC, Z, H_DEC)

    # One-time re-layout (outside the per-call dispatch path).
    kparams = jax.tree_util.tree_map(jax.block_until_ready, prepare_params(params))

    out = autoencoder_forward(x, kparams)
    out = jax.block_until_ready(out)

    ref = reference_forward(x, params)
    assert out.shape == (B * T, N), out.shape
    assert jnp.allclose(out, ref, atol=1e-4, rtol=1e-4), (
        float(jnp.max(jnp.abs(out - ref))))
    print("KERNEL_OK")
</pallas_src>

<mosaic_0001>
module attributes {stable_mosaic.version = 11 : i64} {
  func.func @autoencoder_kernel(%arg0: memref<16x16xf32, #tpu.memory_space<vmem>>, %arg1: memref<16x32xf32, #tpu.memory_space<vmem>>, %arg2: memref<32x32xf32, #tpu.memory_space<vmem>>, %arg3: memref<1x32xf32, #tpu.memory_space<vmem>>, %arg4: memref<32x32xf32, #tpu.memory_space<vmem>>, %arg5: memref<1x32xf32, #tpu.memory_space<vmem>>, %arg6: memref<32x32xf32, #tpu.memory_space<vmem>>, %arg7: memref<32x16xf32, #tpu.memory_space<vmem>>, %arg8: memref<1x16xf32, #tpu.memory_space<vmem>>, %arg9: memref<16x16xf32, #tpu.memory_space<vmem>>, %arg10: memref<16x32xf32, #tpu.memory_space<vmem>>) attributes {dimension_semantics = [], scalar_prefetch = 0 : i64, scratch_operands = 1 : i64, tpu.core_type = #tpu.core_type<tc>} {
    %c0 = arith.constant 0 : index
    %c0_0 = arith.constant 0 : index
    %0 = vector.load %arg2[%c0, %c0_0] : memref<32x32xf32, #tpu.memory_space<vmem>>, vector<32x32xf32>
    %c0_1 = arith.constant 0 : index
    %c0_2 = arith.constant 0 : index
    %1 = vector.load %arg6[%c0_1, %c0_2] : memref<32x32xf32, #tpu.memory_space<vmem>>, vector<32x32xf32>
    %c0_3 = arith.constant 0 : index
    %c0_4 = arith.constant 0 : index
    %2 = vector.load %arg0[%c0_3, %c0_4] : memref<16x16xf32, #tpu.memory_space<vmem>>, vector<16x16xf32>
    %c0_5 = arith.constant 0 : index
    %c0_6 = arith.constant 0 : index
    %3 = vector.load %arg1[%c0_5, %c0_6] : memref<16x32xf32, #tpu.memory_space<vmem>>, vector<16x32xf32>
    %cst = arith.constant dense<0.000000e+00> : vector<16x32xf32>
    %4 = tpu.matmul %2, %3, %cst {dimension_numbers = #tpu.dot_dimension_numbers<[1], [0], [0], [1], [0, 0, 1, 1], [], []>} : vector<16x16xf32>, vector<16x32xf32>, vector<16x32xf32> -> vector<16x32xf32>
    %c0_7 = arith.constant 0 : index
    %c0_8 = arith.constant 0 : index
    %5 = vector.load %arg3[%c0_7, %c0_8] : memref<1x32xf32, #tpu.memory_space<vmem>>, vector<1x32xf32>
    %6 = vector.broadcast %5 : vector<1x32xf32> to vector<16x32xf32>
    %7 = arith.addf %4, %6 : vector<16x32xf32>
    %8 = vector.extract_strided_slice %7 {offsets = [0, 0], sizes = [2, 32], strides = [1, 1]} : vector<16x32xf32> to vector<2x32xf32>
    %9 = math.tanh %8 : vector<2x32xf32>
    %10 = vector.extract_strided_slice %7 {offsets = [2, 0], sizes = [2, 32], strides = [1, 1]} : vector<16x32xf32> to vector<2x32xf32>
    %cst_9 = arith.constant dense<0.000000e+00> : vector<2x32xf32>
    %11 = tpu.matmul %9, %0, %cst_9 {dimension_numbers = #tpu.dot_dimension_numbers<[1], [0], [0], [1], [0, 0, 1, 1], [], []>} : vector<2x32xf32>, vector<32x32xf32>, vector<2x32xf32> -> vector<2x32xf32>
    %12 = arith.addf %10, %11 : vector<2x32xf32>
    %13 = math.tanh %12 : vector<2x32xf32>
    %14 = vector.extract_strided_slice %7 {offsets = [4, 0], sizes = [2, 32], strides = [1, 1]} : vector<16x32xf32> to vector<2x32xf32>
    %cst_10 = arith.constant dense<0.000000e+00> : vector<2x32xf32>
    %15 = tpu.matmul %13, %0, %cst_10 {dimension_numbers = #tpu.dot_dimension_numbers<[1], [0], [0], [1], [0, 0, 1, 1], [], []>} : vector<2x32xf32>, vector<32x32xf32>, vector<2x32xf32> -> vector<2x32xf32>
    %16 = arith.addf %14, %15 : vector<2x32xf32>
    %17 = math.tanh %16 : vector<2x32xf32>
    %18 = vector.extract_strided_slice %7 {offsets = [6, 0], sizes = [2, 32], strides = [1, 1]} : vector<16x32xf32> to vector<2x32xf32>
    %cst_11 = arith.constant dense<0.000000e+00> : vector<2x32xf32>
    %19 = tpu.matmul %17, %0, %cst_11 {dimension_numbers = #tpu.dot_dimension_numbers<[1], [0], [0], [1], [0, 0, 1, 1], [], []>} : vector<2x32xf32>, vector<32x32xf32>, vector<2x32xf32> -> vector<2x32xf32>
    %20 = arith.addf %18, %19 : vector<2x32xf32>
    %21 = math.tanh %20 : vector<2x32xf32>
    %22 = vector.extract_strided_slice %7 {offsets = [8, 0], sizes = [2, 32], strides = [1, 1]} : vector<16x32xf32> to vector<2x32xf32>
    %cst_12 = arith.constant dense<0.000000e+00> : vector<2x32xf32>
    %23 = tpu.matmul %21, %0, %cst_12 {dimension_numbers = #tpu.dot_dimension_numbers<[1], [0], [0], [1], [0, 0, 1, 1], [], []>} : vector<2x32xf32>, vector<32x32xf32>, vector<2x32xf32> -> vector<2x32xf32>
    %24 = arith.addf %22, %23 : vector<2x32xf32>
    %25 = math.tanh %24 : vector<2x32xf32>
    %26 = vector.extract_strided_slice %7 {offsets = [10, 0], sizes = [2, 32], strides = [1, 1]} : vector<16x32xf32> to vector<2x32xf32>
    %cst_13 = arith.constant dense<0.000000e+00> : vector<2x32xf32>
    %27 = tpu.matmul %25, %0, %cst_13 {dimension_numbers = #tpu.dot_dimension_numbers<[1], [0], [0], [1], [0, 0, 1, 1], [], []>} : vector<2x32xf32>, vector<32x32xf32>, vector<2x32xf32> -> vector<2x32xf32>
    %28 = arith.addf %26, %27 : vector<2x32xf32>
    %29 = math.tanh %28 : vector<2x32xf32>
    %30 = vector.extract_strided_slice %7 {offsets = [12, 0], sizes = [2, 32], strides = [1, 1]} : vector<16x32xf32> to vector<2x32xf32>
    %cst_14 = arith.constant dense<0.000000e+00> : vector<2x32xf32>
    %31 = tpu.matmul %29, %0, %cst_14 {dimension_numbers = #tpu.dot_dimension_numbers<[1], [0], [0], [1], [0, 0, 1, 1], [], []>} : vector<2x32xf32>, vector<32x32xf32>, vector<2x32xf32> -> vector<2x32xf32>
    %32 = arith.addf %30, %31 : vector<2x32xf32>
    %33 = math.tanh %32 : vector<2x32xf32>
    %34 = vector.extract_strided_slice %7 {offsets = [14, 0], sizes = [2, 32], strides = [1, 1]} : vector<16x32xf32> to vector<2x32xf32>
    %cst_15 = arith.constant dense<0.000000e+00> : vector<2x32xf32>
    %35 = tpu.matmul %33, %0, %cst_15 {dimension_numbers = #tpu.dot_dimension_numbers<[1], [0], [0], [1], [0, 0, 1, 1], [], []>} : vector<2x32xf32>, vector<32x32xf32>, vector<2x32xf32> -> vector<2x32xf32>
    %36 = arith.addf %34, %35 : vector<2x32xf32>
    %37 = math.tanh %36 : vector<2x32xf32>
    %c0_16 = arith.constant 0 : index
    %c0_17 = arith.constant 0 : index
    %38 = vector.load %arg4[%c0_16, %c0_17] : memref<32x32xf32, #tpu.memory_space<vmem>>, vector<32x32xf32>
    %cst_18 = arith.constant dense<0.000000e+00> : vector<2x32xf32>
    %39 = tpu.matmul %37, %38, %cst_18 {dimension_numbers = #tpu.dot_dimension_numbers<[1], [0], [0], [1], [0, 0, 1, 1], [], []>} : vector<2x32xf32>, vector<32x32xf32>, vector<2x32xf32> -> vector<2x32xf32>
    %c0_19 = arith.constant 0 : index
    %c0_20 = arith.constant 0 : index
    %40 = vector.load %arg5[%c0_19, %c0_20] : memref<1x32xf32, #tpu.memory_space<vmem>>, vector<1x32xf32>
    %41 = vector.broadcast %40 : vector<1x32xf32> to vector<2x32xf32>
    %42 = arith.addf %39, %41 : vector<2x32xf32>
    %43 = math.tanh %42 : vector<2x32xf32>
    %c0_21 = arith.constant 0 : index
    %c0_22 = arith.constant 0 : index
    %44 = vector.load %arg10[%c0_21, %c0_22] : memref<16x32xf32, #tpu.memory_space<vmem>>, vector<2x32xf32>
    tpu.vector_store %arg10[%c0_21, %c0_22], %43 {strides = array<i32>} : memref<16x32xf32, #tpu.memory_space<vmem>>, vector<2x32xf32>,
    %cst_23 = arith.constant dense<0.000000e+00> : vector<2x32xf32>
    %45 = tpu.matmul %43, %1, %cst_23 {dimension_numbers = #tpu.dot_dimension_numbers<[1], [0], [0], [1], [0, 0, 1, 1], [], []>} : vector<2x32xf32>, vector<32x32xf32>, vector<2x32xf32> -> vector<2x32xf32>
    %46 = arith.addf %42, %45 : vector<2x32xf32>
    %47 = math.tanh %46 : vector<2x32xf32>
    %c2 = arith.constant 2 : index
    %c0_24 = arith.constant 0 : index
    %48 = vector.load %arg10[%c2, %c0_24] : memref<16x32xf32, #tpu.memory_space<vmem>>, vector<2x32xf32>
    tpu.vector_store %arg10[%c2, %c0_24], %47 {strides = array<i32>} : memref<16x32xf32, #tpu.memory_space<vmem>>, vector<2x32xf32>,
    %cst_25 = arith.constant dense<0.000000e+00> : vector<2x32xf32>
    %49 = tpu.matmul %47, %1, %cst_25 {dimension_numbers = #tpu.dot_dimension_numbers<[1], [0], [0], [1], [0, 0, 1, 1], [], []>} : vector<2x32xf32>, vector<32x32xf32>, vector<2x32xf32> -> vector<2x32xf32>
    %50 = arith.addf %42, %49 : vector<2x32xf32>
    %51 = math.tanh %50 : vector<2x32xf32>
    %c4 = arith.constant 4 : index
    %c0_26 = arith.constant 0 : index
    %52 = vector.load %arg10[%c4, %c0_26] : memref<16x32xf32, #tpu.memory_space<vmem>>, vector<2x32xf32>
    tpu.vector_store %arg10[%c4, %c0_26], %51 {strides = array<i32>} : memref<16x32xf32, #tpu.memory_space<vmem>>, vector<2x32xf32>,
    %cst_27 = arith.constant dense<0.000000e+00> : vector<2x32xf32>
    %53 = tpu.matmul %51, %1, %cst_27 {dimension_numbers = #tpu.dot_dimension_numbers<[1], [0], [0], [1], [0, 0, 1, 1], [], []>} : vector<2x32xf32>, vector<32x32xf32>, vector<2x32xf32> -> vector<2x32xf32>
    %54 = arith.addf %42, %53 : vector<2x32xf32>
    %55 = math.tanh %54 : vector<2x32xf32>
    %c6 = arith.constant 6 : index
    %c0_28 = arith.constant 0 : index
    %56 = vector.load %arg10[%c6, %c0_28] : memref<16x32xf32, #tpu.memory_space<vmem>>, vector<2x32xf32>
    tpu.vector_store %arg10[%c6, %c0_28], %55 {strides = array<i32>} : memref<16x32xf32, #tpu.memory_space<vmem>>, vector<2x32xf32>,
    %cst_29 = arith.constant dense<0.000000e+00> : vector<2x32xf32>
    %57 = tpu.matmul %55, %1, %cst_29 {dimension_numbers = #tpu.dot_dimension_numbers<[1], [0], [0], [1], [0, 0, 1, 1], [], []>} : vector<2x32xf32>, vector<32x32xf32>, vector<2x32xf32> -> vector<2x32xf32>
    %58 = arith.addf %42, %57 : vector<2x32xf32>
    %59 = math.tanh %58 : vector<2x32xf32>
    %c8 = arith.constant 8 : index
    %c0_30 = arith.constant 0 : index
    %60 = vector.load %arg10[%c8, %c0_30] : memref<16x32xf32, #tpu.memory_space<vmem>>, vector<2x32xf32>
    tpu.vector_store %arg10[%c8, %c0_30], %59 {strides = array<i32>} : memref<16x32xf32, #tpu.memory_space<vmem>>, vector<2x32xf32>,
    %cst_31 = arith.constant dense<0.000000e+00> : vector<2x32xf32>
    %61 = tpu.matmul %59, %1, %cst_31 {dimension_numbers = #tpu.dot_dimension_numbers<[1], [0], [0], [1], [0, 0, 1, 1], [], []>} : vector<2x32xf32>, vector<32x32xf32>, vector<2x32xf32> -> vector<2x32xf32>
    %62 = arith.addf %42, %61 : vector<2x32xf32>
    %63 = math.tanh %62 : vector<2x32xf32>
    %c10 = arith.constant 10 : index
    %c0_32 = arith.constant 0 : index
    %64 = vector.load %arg10[%c10, %c0_32] : memref<16x32xf32, #tpu.memory_space<vmem>>, vector<2x32xf32>
    tpu.vector_store %arg10[%c10, %c0_32], %63 {strides = array<i32>} : memref<16x32xf32, #tpu.memory_space<vmem>>, vector<2x32xf32>,
    %cst_33 = arith.constant dense<0.000000e+00> : vector<2x32xf32>
    %65 = tpu.matmul %63, %1, %cst_33 {dimension_numbers = #tpu.dot_dimension_numbers<[1], [0], [0], [1], [0, 0, 1, 1], [], []>} : vector<2x32xf32>, vector<32x32xf32>, vector<2x32xf32> -> vector<2x32xf32>
    %66 = arith.addf %42, %65 : vector<2x32xf32>
    %67 = math.tanh %66 : vector<2x32xf32>
    %c12 = arith.constant 12 : index
    %c0_34 = arith.constant 0 : index
    %68 = vector.load %arg10[%c12, %c0_34] : memref<16x32xf32, #tpu.memory_space<vmem>>, vector<2x32xf32>
    tpu.vector_store %arg10[%c12, %c0_34], %67 {strides = array<i32>} : memref<16x32xf32, #tpu.memory_space<vmem>>, vector<2x32xf32>,
    %cst_35 = arith.constant dense<0.000000e+00> : vector<2x32xf32>
    %69 = tpu.matmul %67, %1, %cst_35 {dimension_numbers = #tpu.dot_dimension_numbers<[1], [0], [0], [1], [0, 0, 1, 1], [], []>} : vector<2x32xf32>, vector<32x32xf32>, vector<2x32xf32> -> vector<2x32xf32>
    %70 = arith.addf %42, %69 : vector<2x32xf32>
    %71 = math.tanh %70 : vector<2x32xf32>
    %c14 = arith.constant 14 : index
    %c0_36 = arith.constant 0 : index
    %72 = vector.load %arg10[%c14, %c0_36] : memref<16x32xf32, #tpu.memory_space<vmem>>, vector<2x32xf32>
    tpu.vector_store %arg10[%c14, %c0_36], %71 {strides = array<i32>} : memref<16x32xf32, #tpu.memory_space<vmem>>, vector<2x32xf32>,
    %c0_37 = arith.constant 0 : index
    %c0_38 = arith.constant 0 : index
    %73 = vector.load %arg10[%c0_37, %c0_38] : memref<16x32xf32, #tpu.memory_space<vmem>>, vector<16x32xf32>
    %c0_39 = arith.constant 0 : index
    %c0_40 = arith.constant 0 : index
    %74 = vector.load %arg7[%c0_39, %c0_40] : memref<32x16xf32, #tpu.memory_space<vmem>>, vector<32x16xf32>
    %cst_41 = arith.constant dense<0.000000e+00> : vector<16x16xf32>
    %75 = tpu.matmul %73, %74, %cst_41 {dimension_numbers = #tpu.dot_dimension_numbers<[1], [0], [0], [1], [0, 0, 1, 1], [], []>} : vector<16x32xf32>, vector<32x16xf32>, vector<16x16xf32> -> vector<16x16xf32>
    %c0_42 = arith.constant 0 : index
    %c0_43 = arith.constant 0 : index
    %76 = vector.load %arg8[%c0_42, %c0_43] : memref<1x16xf32, #tpu.memory_space<vmem>>, vector<1x16xf32>
    %77 = vector.broadcast %76 : vector<1x16xf32> to vector<16x16xf32>
    %78 = arith.addf %75, %77 : vector<16x16xf32>
    %c0_44 = arith.constant 0 : index
    %c0_45 = arith.constant 0 : index
    %79 = vector.load %arg9[%c0_44, %c0_45] : memref<16x16xf32, #tpu.memory_space<vmem>>, vector<16x16xf32>
    tpu.vector_store %arg9[%c0_44, %c0_45], %78 {strides = array<i32>} : memref<16x16xf32, #tpu.memory_space<vmem>>, vector<16x16xf32>,
    return
  }
}

</mosaic_0001>

<bundles_post_ra>
// kernel: autoencoder_forward.1
= control target key start
LH: loop header
LB: loop body
LE: loop exit
PB: predicated region body
PF: predicated region fallthrough
CT: control target
= control target key end

     0   :  { %14 = vsyncpa [#allocation4], 0  ;;  %s640_s12 = smov [#allocation3]   ;;  %s641_s14 = smov 128   ;;  %s788_s0 = inlined_call_operand.vmem [shape: f32[16,16], index: 0, kind: input, shape index: {}]   ;;  %s789_s1 = inlined_call_operand.vmem [shape: f32[16,32], index: 1, kind: input, shape index: {}]   ;;  %s790_s2 = inlined_call_operand.vmem [shape: f32[32,32], index: 2, kind: input, shape index: {}]   ;;  %s791_s3 = inlined_call_operand.vmem [shape: f32[1,32], index: 3, kind: input, shape index: {}]   ;;  %s792_s4 = inlined_call_operand.vmem [shape: f32[32,32], index: 4, kind: input, shape index: {}]   ;;  %s793_s5 = inlined_call_operand.vmem [shape: f32[1,32], index: 5, kind: input, shape index: {}]   ;;  %s794_s6 = inlined_call_operand.hbm [shape: f32[32,32], index: 6, kind: input, shape index: {}]   ;;  %s795_s7 = inlined_call_operand.vmem [shape: f32[32,16], index: 7, kind: input, shape index: {}]   ;;  %s796_s8 = inlined_call_operand.vmem [shape: f32[1,16], index: 8, kind: input, shape index: {}]   ;;  %s797_s9 = inlined_call_operand.vmem [shape: f32[16,16], index: 9, kind: output, shape index: {}]  }
   0x1   :  { %s31_s11 = sshll.u32 %s794_s6, 4  ;;  %s33_s13 = sshll.u32 %s640_s12, 4  ;;  %s32_s11 = int_to_ptr.hbm [resolvable:$true] %s31_s11  ;;  %s34_s13 = int_to_ptr.vmem [resolvable:$true] %s33_s13 }
   0x2   :  { %s642_s15 = smov 8  }
   0x3   :  { %39 = dma.hbm_to_vmem [thread:$0]  %s32_s11, 512, %s34_s13, [#allocation4], %s641_s14, %s641_s14, %s642_s15  }
   0x4   :  { %638 = dma.done.wait [#allocation4], 512  }
   0x5   :  { %639 = vsyncadd [#allocation4], 4294966784  ;;  %v59_v0 = vld [vmem:[%s789_s1 + $0x8] sm:$0xff]  ;;  %v58_v1 = vld [vmem:[%s789_s1] sm:$0xff]  ;;  %vm64_vm0 = vcmask 130048   ;;  %vm95_vm1 = vcmask 261120  }
   0x6   :  { %85 = vmatpush.msra.mxu0 %v59_v0  ;;  %v56_v2 = vld [vmem:[%s788_s0] sm:$0xff]  ;;  %v51_v3 = vld [vmem:[%s790_s2 + $0x18] sm:$0xff]  ;;  %v50_v4 = vld [vmem:[%s790_s2 + $0x10] sm:$0xff]  ;;  %vm327_vm2 = vcmask 254976  }
   0x7   :  { %111 = vmatpush.msra.mxu2 %v51_v3  ;;  %169 = vmatpush.msra.mxu3 %v51_v3  ;;  %v49_v5 = vld [vmem:[%s790_s2 + $0x8] sm:$0xff]  ;;  %v48_v6 = vld [vmem:[%s790_s2] sm:$0xff]  ;;  %v297_v42 = vld [vmem:[%s792_s4 + $0x18] sm:$0xff] }
   0x8   :  { %86 = vmatpush.msra.mxu0 %v58_v1  ;;  %198 = vmatpush.msra.mxu1 %v51_v3  ;;  %v579_v7 = vld [vmem:[%s791_s3] ss:$0 sm:$0xff]  ;;  %v57_v21 = vld [vmem:[%s788_s0 + $0x8] sm:$0xff]  ;;  %v296_v43 = vld [vmem:[%s792_s4 + $0x10] sm:$0xff] }
   0x9   :  { %557 = vmatmul.msk.f32.vlgmr.msra.gmra.mxu0 %vm64_vm0, %v56_v2  ;;  %112 = vmatpush.msra.mxu2 %v50_v4  ;;  %v295_v44 = vld [vmem:[%s792_s4 + $0x8] sm:$0xff]  ;;  %v294_v45 = vld [vmem:[%s792_s4] sm:$0xff]  ;;  %v53_v53 = vld [vmem:[#allocation3 + $0x8] sm:$0xff] }
   0xa   :  { %281 = vmatpush.msrb.mxu0 %v51_v3  ;;  %170 = vmatpush.msra.mxu3 %v50_v4  ;;  %v55_v51 = vld [vmem:[#allocation3 + $0x18] sm:$0xff]  ;;  %v54_v52 = vld [vmem:[#allocation3 + $0x10] sm:$0xff]  ;;  %v52_v54 = vld [vmem:[#allocation3] sm:$0xff] }
   0xb   :  { %199 = vmatpush.msra.mxu1 %v50_v4  ;;  %113 = vmatpush.msra.mxu2 %v49_v5  ;;  %v580_v55 = vld [vmem:[%s793_s5] ss:$0 sm:$0xff]  ;;  %v516_v1 = vld [vmem:[%s795_s7 + $0x18] sm:$0xff]  ;;  %v515_v2 = vld [vmem:[%s795_s7 + $0x10] sm:$0xff] }
   0xc   :  { %282 = vmatpush.msrb.mxu0 %v50_v4  ;;  %171 = vmatpush.msra.mxu3 %v49_v5 }
   0xd   :  { %200 = vmatpush.msra.mxu1 %v49_v5  ;;  %114 = vmatpush.msra.mxu2 %v48_v6 }
   0xe   :  { %283 = vmatpush.msrb.mxu0 %v49_v5  ;;  %172 = vmatpush.msra.mxu3 %v48_v6 }
   0xf   :  { %140 = vmatpush.msrb.mxu2 %v51_v3  ;;  %201 = vmatpush.msra.mxu1 %v48_v6 }
  0x10   :  { %252 = vmatpush.msrb.mxu3 %v51_v3  ;;  %284 = vmatpush.msrb.mxu0 %v48_v6 }
  0x11   :  { %141 = vmatpush.msrb.mxu2 %v50_v4  ;;  %558 = vmatmul.msk.f32.gmra.mxu0 %vm64_vm0, %v57_v21 }
  0x12   :  { %253 = vmatpush.msrb.mxu3 %v50_v4  ;;  %318 = vmatpush.msrb.mxu1 %v297_v42 }
  0x13   :  { %142 = vmatpush.msrb.mxu2 %v49_v5  ;;  %396 = vmatpush.msra.mxu0 %v55_v51 }
  0x14   :  { %254 = vmatpush.msrb.mxu3 %v49_v5  ;;  %319 = vmatpush.msrb.mxu1 %v296_v43 }
  0x15   :  { %143 = vmatpush.msrb.mxu2 %v48_v6  ;;  %397 = vmatpush.msra.mxu0 %v54_v52 }
  0x16   :  { %255 = vmatpush.msrb.mxu3 %v48_v6  ;;  %320 = vmatpush.msrb.mxu1 %v295_v44 }
  0x17   :  { %398 = vmatpush.msra.mxu0 %v53_v53 }
  0x18   :  { %321 = vmatpush.msrb.mxu1 %v294_v45 }
  0x19   :  { %399 = vmatpush.msra.mxu0 %v52_v54 }
  0x86   :  { %v88_v8 = vpop.f32.mrf.mxu0 }
  0x87   :  { %v89_v9 = vadd.f32 %v579_v7, %v88_v8 }
  0x89   :  { %582 = vtanh.f32 %v89_v9 }
  0x8e   :  { %v91_v27 = vpop.f32.mrf.mxu0 }
  0x8f   :  { %v583_v10 = vpop.eup %582  ;;  %v92_v28 = vadd.f32 %v579_v7, %v91_v27 }
  0x90   :  { %559 = vmatmul.msk.f32.vlgmr.msra.gmra.mxu2 %vm95_vm1, %v583_v10 }
  0x91   :  { %223 = vmatpush.msra.mxu2 %v51_v3  ;;  %v514_v3 = vld [vmem:[%s795_s7 + $0x8] sm:$0xff] }
  0x93   :  { %224 = vmatpush.msra.mxu2 %v50_v4  ;;  %v513_v4 = vld [vmem:[%s795_s7] sm:$0xff] }
  0x95   :  { %225 = vmatpush.msra.mxu2 %v49_v5 }
  0x97   :  { %226 = vmatpush.msra.mxu2 %v48_v6 }
 0x113   :  { %v116_v11 = vpop.f32.mrf.mxu2 }
 0x114   :  { %v120_v12 = vrot.slane %v116_v11, 6  ;;  %v581_v11 = vld [vmem:[%s796_s8] ss:$0 sm:$0xff] }
 0x116   :  { %v122_v13 = vadd.f32 %v120_v12, %v89_v9 }
 0x118   :  { %584 = vtanh.f32 %v122_v13 }
 0x11e   :  { %v585_v14 = vpop.eup %584 }
 0x11f   :  { %v125_v15 = vrot.slane %v585_v14, 2 }
 0x121   :  { %560 = vmatmul.msk.f32.vlgmr.msrb.gmra.mxu2 %vm95_vm1, %v125_v15 }
 0x122   :  { %344 = vmatpush.msrb.mxu2 %v55_v51 }
 0x124   :  { %345 = vmatpush.msrb.mxu2 %v54_v52 }
 0x126   :  { %346 = vmatpush.msrb.mxu2 %v53_v53 }
 0x128   :  { %347 = vmatpush.msrb.mxu2 %v52_v54 }
 0x1a4   :  { %v145_v16 = vpop.f32.mrf.mxu2 }
 0x1a5   :  { %v149_v17 = vrot.slane %v145_v16, 4 }
 0x1a7   :  { %v151_v18 = vadd.f32 %v149_v17, %v89_v9 }
 0x1a9   :  { %586 = vtanh.f32 %v151_v18 }
 0x1af   :  { %v587_v19 = vpop.eup %586 }
 0x1b0   :  { %v154_v20 = vrot.slane %v587_v19, 4 }
 0x1b2   :  { %561 = vmatmul.msk.f32.vlgmr.msra.gmra.mxu3 %vm95_vm1, %v154_v20 }
 0x1b3   :  { %370 = vmatpush.msra.mxu3 %v55_v51 }
 0x1b5   :  { %371 = vmatpush.msra.mxu3 %v54_v52 }
 0x1b7   :  { %372 = vmatpush.msra.mxu3 %v53_v53 }
 0x1b9   :  { %373 = vmatpush.msra.mxu3 %v52_v54 }
 0x235   :  { %v174_v22 = vpop.f32.mrf.mxu3 }
 0x236   :  { %v178_v23 = vrot.slane %v174_v22, 2 }
 0x238   :  { %v180_v24 = vadd.f32 %v178_v23, %v89_v9 }
 0x23a   :  { %588 = vtanh.f32 %v180_v24 }
 0x240   :  { %v589_v25 = vpop.eup %588 }
 0x241   :  { %v183_v26 = vrot.slane %v589_v25, 6 }
 0x243   :  { %562 = vmatmul.msk.f32.vlgmr.msra.gmra.mxu1 %vm95_vm1, %v183_v26 }
 0x244   :  { %422 = vmatpush.msra.mxu1 %v55_v51 }
 0x246   :  { %423 = vmatpush.msra.mxu1 %v54_v52 }
 0x248   :  { %424 = vmatpush.msra.mxu1 %v53_v53 }
 0x24a   :  { %425 = vmatpush.msra.mxu1 %v52_v54 }
 0x2c0   :  { %v203_v29 = vpop.f32.mrf.mxu1 }
 0x2c1   :  { %v206_v30 = vadd.f32 %v203_v29, %v92_v28 }
 0x2c3   :  { %590 = vtanh.f32 %v206_v30 }
 0x2c9   :  { %v591_v31 = vpop.eup %590 }
 0x2ca   :  { %563 = vmatmul.msk.f32.vlgmr.msra.gmra.mxu2 %vm95_vm1, %v591_v31 }
 0x2cb   :  { %448 = vmatpush.msra.mxu2 %v55_v51 }
 0x2cd   :  { %449 = vmatpush.msra.mxu2 %v54_v52 }
 0x2cf   :  { %450 = vmatpush.msra.mxu2 %v53_v53 }
 0x2d1   :  { %451 = vmatpush.msra.mxu2 %v52_v54 }
 0x34d   :  { %v228_v32 = vpop.f32.mrf.mxu2 }
 0x34e   :  { %v232_v33 = vrot.slane %v228_v32, 6 }
 0x350   :  { %v234_v34 = vadd.f32 %v232_v33, %v92_v28 }
 0x352   :  { %592 = vtanh.f32 %v234_v34 }
 0x358   :  { %v593_v35 = vpop.eup %592 }
 0x359   :  { %v237_v36 = vrot.slane %v593_v35, 2 }
 0x35b   :  { %564 = vmatmul.msk.f32.vlgmr.msrb.gmra.mxu3 %vm95_vm1, %v237_v36 }
 0x35c   :  { %474 = vmatpush.msrb.mxu3 %v55_v51 }
 0x35e   :  { %475 = vmatpush.msrb.mxu3 %v54_v52 }
 0x360   :  { %476 = vmatpush.msrb.mxu3 %v53_v53 }
 0x362   :  { %477 = vmatpush.msrb.mxu3 %v52_v54 }
 0x3de   :  { %v257_v37 = vpop.f32.mrf.mxu3 }
 0x3df   :  { %v261_v38 = vrot.slane %v257_v37, 4 }
 0x3e1   :  { %v263_v39 = vadd.f32 %v261_v38, %v92_v28 }
 0x3e3   :  { %594 = vtanh.f32 %v263_v39 }
 0x3e9   :  { %v595_v40 = vpop.eup %594 }
 0x3ea   :  { %v266_v41 = vrot.slane %v595_v40, 4 }
 0x3ec   :  { %565 = vmatmul.msk.f32.vlgmr.msrb.gmra.mxu0 %vm95_vm1, %v266_v41 }
 0x3ed   :  { %500 = vmatpush.msrb.mxu0 %v55_v51 }
 0x3ef   :  { %501 = vmatpush.msrb.mxu0 %v54_v52 }
 0x3f1   :  { %502 = vmatpush.msrb.mxu0 %v53_v53 }
 0x3f3   :  { %503 = vmatpush.msrb.mxu0 %v52_v54 }
 0x469   :  { %v286_v46 = vpop.f32.mrf.mxu0 }
 0x46a   :  { %v290_v47 = vrot.slane %v286_v46, 2 }
 0x46c   :  { %v292_v48 = vadd.f32 %v290_v47, %v92_v28 }
 0x46e   :  { %596 = vtanh.f32 %v292_v48 }
 0x474   :  { %v597_v49 = vpop.eup %596 }
 0x475   :  { %v303_v50 = vrot.slane %v597_v49, 6 }
 0x477   :  { %566 = vmatmul.msk.f32.vlgmr.msrb.gmra.mxu1 %vm95_vm1, %v303_v50 }
 0x478   :  { %539 = vmatpush.msrb.mxu1 %v516_v1 }
 0x47a   :  { %540 = vmatpush.msrb.mxu1 %v515_v2 }
 0x47c   :  { %541 = vmatpush.msrb.mxu1 %v514_v3 }
 0x47e   :  { %542 = vmatpush.msrb.mxu1 %v513_v4 }
 0x4f4   :  { %v323_v56 = vpop.f32.mrf.mxu1 }
 0x4f5   :  { %v324_v57 = vadd.f32 %v580_v55, %v323_v56 }
 0x4f7   :  { %598 = vtanh.f32 %v324_v57 }
 0x4fd   :  { %v599_v58 = vpop.eup %598 }
 0x4fe   :  { %567 = vmatmul.msk.f32.vlgmr.msrb.gmra.mxu2 %vm95_vm1, %v599_v58  ;;  %328 = vst.msk [vmem:[#allocation2] sm:$0x3] %vm327_vm2, %v599_v58 }
 0x581   :  { %v349_v59 = vpop.f32.mrf.mxu2 }
 0x582   :  { %v352_v60 = vadd.f32 %v349_v59, %v324_v57 }
 0x584   :  { %600 = vtanh.f32 %v352_v60 }
 0x58a   :  { %v601_v61 = vpop.eup %600 }
 0x58b   :  { %354 = vst.msk [vmem:[#allocation2 + $0x2] sm:$0x3] %vm327_vm2, %v601_v61  ;;  %568 = vmatmul.msk.f32.vlgmr.msra.gmra.mxu3 %vm95_vm1, %v601_v61 }
 0x60e   :  { %v375_v62 = vpop.f32.mrf.mxu3 }
 0x60f   :  { %v378_v63 = vadd.f32 %v375_v62, %v324_v57 }
 0x611   :  { %602 = vtanh.f32 %v378_v63 }
 0x617   :  { %v603_v0 = vpop.eup %602 }
 0x618   :  { %380 = vst.msk [vmem:[#allocation2 + $0x4] sm:$0x3] %vm327_vm2, %v603_v0  ;;  %569 = vmatmul.msk.f32.vlgmr.msra.gmra.mxu0 %vm95_vm1, %v603_v0 }
 0x695   :  { %v401_v5 = vpop.f32.mrf.mxu0 }
 0x696   :  { %v404_v6 = vadd.f32 %v401_v5, %v324_v57 }
 0x698   :  { %604 = vtanh.f32 %v404_v6 }
 0x69e   :  { %v605_v7 = vpop.eup %604 }
 0x69f   :  { %406 = vst.msk [vmem:[#allocation2 + $0x6] sm:$0x3] %vm327_vm2, %v605_v7  ;;  %570 = vmatmul.msk.f32.vlgmr.msra.gmra.mxu1 %vm95_vm1, %v605_v7 }
 0x6a6   :  { %v511_v8 = vld [vmem:[#allocation2] sm:$0xff] }
 0x6a7   :  { %574 = vmatmul.msk.f32.vlgmr.msrb.gmra.mxu1 %vm95_vm1, %v511_v8 }
 0x71c   :  { %v427_v9 = vpop.f32.mrf.mxu1 }
 0x71d   :  { %v430_v10 = vadd.f32 %v427_v9, %v324_v57 }
 0x71f   :  { %606 = vtanh.f32 %v430_v10 }
 0x724   :  { %v544_v12 = vpop.f32.mrf.mxu1 }
 0x725   :  { %v607_v13 = vpop.eup %606  ;;  %v545_v14 = vadd.f32 %v581_v11, %v544_v12 }
 0x726   :  { %432 = vst.msk [vmem:[#allocation2 + $0x8] sm:$0x3] %vm327_vm2, %v607_v13  ;;  %571 = vmatmul.msk.f32.vlgmr.msra.gmra.mxu2 %vm95_vm1, %v607_v13 }
 0x727   :  { %550 = vst.msk [vmem:[%s797_s9] sm:$0xff] %vm64_vm0, %v545_v14 }
 0x7a9   :  { %v453_v15 = vpop.f32.mrf.mxu2 }
 0x7aa   :  { %v456_v16 = vadd.f32 %v453_v15, %v324_v57 }
 0x7ac   :  { %608 = vtanh.f32 %v456_v16 }
 0x7b2   :  { %v609_v17 = vpop.eup %608 }
 0x7b3   :  { %458 = vst.msk [vmem:[#allocation2 + $0xa] sm:$0x3] %vm327_vm2, %v609_v17  ;;  %572 = vmatmul.msk.f32.vlgmr.msrb.gmra.mxu3 %vm95_vm1, %v609_v17 }
 0x836   :  { %v479_v18 = vpop.f32.mrf.mxu3 }
 0x837   :  { %v482_v19 = vadd.f32 %v479_v18, %v324_v57 }
 0x839   :  { %610 = vtanh.f32 %v482_v19 }
 0x83f   :  { %v611_v20 = vpop.eup %610 }
 0x840   :  { %484 = vst.msk [vmem:[#allocation2 + $0xc] sm:$0x3] %vm327_vm2, %v611_v20  ;;  %573 = vmatmul.msk.f32.vlgmr.msrb.gmra.mxu0 %vm95_vm1, %v611_v20 }
 0x8bd   :  { %v505_v21 = vpop.f32.mrf.mxu0 }
 0x8be   :  { %v508_v22 = vadd.f32 %v505_v21, %v324_v57 }
 0x8c0   :  { %612 = vtanh.f32 %v508_v22 }
 0x8c6   :  { %v613_v23 = vpop.eup %612 }
 0x8c7   :  { %510 = vst.msk [vmem:[#allocation2 + $0xe] sm:$0x3] %vm327_vm2, %v613_v23 }
 0x8ce   :  { %v512_v24 = vld [vmem:[#allocation2 + $0x8] sm:$0xff] }
 0x8cf   :  { %575 = vmatmul.msk.f32.gmra.mxu1 %vm95_vm1, %v512_v24 }
 0x94c   :  { %v547_v25 = vpop.f32.mrf.mxu1 }
 0x94d   :  { %v548_v26 = vadd.f32 %v581_v11, %v547_v25 }
 0x94f   :  { %551 = vst.msk [vmem:[%s797_s9 + $0x8] sm:$0xff] %vm64_vm0, %v548_v26 }
 0x950   :  { %556 = vsyncpa [#allocation4], 1 }

</bundles_post_ra>
